<compile_context>
chip_gen: v6e
topology: v6e:2x2x1
jax: 0.10.0
libtpu: 0.0.40
codegen_flags: <defaults>
</compile_context>

<pallas_src>
import jax
import jax.numpy as jnp
import numpy as np
from jax.experimental import pallas as pl
from jax.experimental.pallas import tpu as pltpu

EPS = 1e-5
LANE = 128
VMEM_LIMIT = 32 * 1024 * 1024  # conservative: fits v5e/v6e/v7x scoped VMEM


def _round_up(x, m):
    return (x + m - 1) // m * m


def _accum_stats(y_f32, sum_ref, ssq_ref):
    """Accumulate per-channel partial sum / sum-of-squares into (8, C) refs."""
    rows, c = y_f32.shape
    if rows % 8 == 0:
        yr = y_f32.reshape(rows // 8, 8, c)
        sum_ref[...] += jnp.sum(yr, axis=0)
        ssq_ref[...] += jnp.sum(yr * yr, axis=0)
    else:  # fallback for odd row counts (not hit in the test)
        sum_ref[0:1, :] += jnp.sum(y_f32, axis=0, keepdims=True)
        ssq_ref[0:1, :] += jnp.sum(y_f32 * y_f32, axis=0, keepdims=True)


# ----------------------------------------------------------------------------
# Kernels
# ----------------------------------------------------------------------------
def _conv1_stats_kernel(x_ref, w_ref, y_ref, sum_ref, ssq_ref):
    # conv1 (1x1) as a matmul over an M-tile + BN1 partial statistics.
    @pl.when(pl.program_id(0) == 0)
    def _init():
        sum_ref[...] = jnp.zeros_like(sum_ref)
        ssq_ref[...] = jnp.zeros_like(ssq_ref)

    y = jnp.dot(x_ref[...], w_ref[...], preferred_element_type=jnp.float32)
    y_ref[...] = y.astype(y_ref.dtype)
    _accum_stats(y, sum_ref, ssq_ref)


def _conv2_stats_kernel(y1_ref, sc_ref, sh_ref, w2_ref,
                        y2_ref, sum_ref, ssq_ref, pad_ref):
    # deferred BN1 + ReLU, then 3x3 conv (pad=1) as ONE im2col matmul,
    # plus BN2 partial statistics.  One image per grid step.
    @pl.when(pl.program_id(0) == 0)
    def _init():
        sum_ref[...] = jnp.zeros_like(sum_ref)
        ssq_ref[...] = jnp.zeros_like(ssq_ref)
        pad_ref[...] = jnp.zeros_like(pad_ref)  # halo stays zero forever

    _, h, w, c = y1_ref.shape
    scale = sc_ref[...].reshape(1, 1, c)
    shift = sh_ref[...].reshape(1, 1, c)
    a = jnp.maximum(y1_ref[0].astype(jnp.float32) * scale + shift, 0.0)
    pad_ref[1:h + 1, 1:w + 1, :] = a.astype(pad_ref.dtype)  # interior only

    # im2col: 9 shifted taps concatenated on the lane axis -> K = 9*c matmul
    taps = [pad_ref[dy:dy + h, dx:dx + w, :]
            for dy in range(3) for dx in range(3)]
    col = jnp.concatenate(taps, axis=-1).reshape(h * w, 9 * c)
    y2 = jnp.dot(col, w2_ref[...], preferred_element_type=jnp.float32)

    y2_ref[...] = y2.reshape(1, h, w, c).astype(y2_ref.dtype)
    _accum_stats(y2, sum_ref, ssq_ref)


def _conv3_stats_kernel(y2_ref, sc_ref, sh_ref, w3_ref, y3_ref, sum_ref, ssq_ref):
    # deferred BN2 + ReLU, then conv3 (1x1) matmul + BN3 partial statistics.
    @pl.when(pl.program_id(0) == 0)
    def _init():
        sum_ref[...] = jnp.zeros_like(sum_ref)
        ssq_ref[...] = jnp.zeros_like(ssq_ref)

    a = jnp.maximum(y2_ref[...].astype(jnp.float32) * sc_ref[...] + sh_ref[...], 0.0)
    y = jnp.dot(a.astype(w3_ref.dtype), w3_ref[...],
                preferred_element_type=jnp.float32)
    y3_ref[...] = y.astype(y3_ref.dtype)
    _accum_stats(y, sum_ref, ssq_ref)


def _bn_residual_relu_kernel(y3_ref, x_ref, sc_ref, sh_ref, o_ref):
    # deferred BN3 + residual add + ReLU (pure elementwise, parallel grid).
    y = y3_ref[...].astype(jnp.float32) * sc_ref[...] + sh_ref[...]
    o_ref[...] = jnp.maximum(y + x_ref[...].astype(jnp.float32), 0.0)


# ----------------------------------------------------------------------------
# Wrapper
# ----------------------------------------------------------------------------
def _bn_scale_shift(sum8, ssq8, count, gamma_p, beta_p):
    """Finalize global training-mode BN stats -> per-channel (scale, shift)."""
    s = jnp.sum(sum8, axis=0)
    ss = jnp.sum(ssq8, axis=0)
    mean = s / count
    var = jnp.maximum(ss / count - mean * mean, 0.0)  # biased variance
    scale = gamma_p * jax.lax.rsqrt(var + EPS)
    shift = beta_p - mean * scale
    return scale.reshape(1, -1), shift.reshape(1, -1)


def bottleneck_forward(x_nchw, params, *, matmul_dtype=jnp.float32, tile_m=1024):
    """Bottleneck forward (stride=1, groups=1, dilation=1, downsample=None)."""
    w1, g1, b1, w2, g2, b2, w3, g3, b3 = params
    N, Cin, H, W = x_nchw.shape
    width = w1.shape[1]
    Cout = w3.shape[1]
    assert Cin == Cout, "residual add requires inplanes == planes * expansion"
    M = N * H * W
    assert M % 8 == 0, "N*H*W must be a multiple of 8"

    Cin_p = _round_up(Cin, LANE)
    Wd_p = _round_up(width, LANE)
    Cout_p = _round_up(Cout, LANE)

    tile_m = max(8, min(tile_m, M))
    if M % tile_m != 0 or tile_m % 8 != 0:
        tile_m = max(t for t in range(8, tile_m + 1, 8) if M % t == 0)
    n_tiles = M // tile_m

    f32 = jnp.float32
    itemsize = jnp.dtype(matmul_dtype).itemsize

    # ---- layout + lane padding (done once in the wrapper) -------------------
    x_nhwc = jnp.transpose(x_nchw, (0, 2, 3, 1)).astype(f32)
    x2d = jnp.pad(x_nhwc.reshape(M, Cin),
                  ((0, 0), (0, Cin_p - Cin))).astype(matmul_dtype)

    w1_p = jnp.pad(w1.astype(f32),
                   ((0, Cin_p - Cin), (0, Wd_p - width))).astype(matmul_dtype)
    w2_p = jnp.zeros((3, 3, Wd_p, Wd_p), f32).at[:, :, :width, :width].set(
        w2.astype(f32))
    w2_flat = w2_p.reshape(9 * Wd_p, Wd_p).astype(matmul_dtype)
    w3_p = jnp.pad(w3.astype(f32),
                   ((0, Wd_p - width), (0, Cout_p - Cout))).astype(matmul_dtype)

    g1p = jnp.pad(g1.astype(f32), (0, Wd_p - width))
    b1p = jnp.pad(b1.astype(f32), (0, Wd_p - width))
    g2p = jnp.pad(g2.astype(f32), (0, Wd_p - width))
    b2p = jnp.pad(b2.astype(f32), (0, Wd_p - width))
    g3p = jnp.pad(g3.astype(f32), (0, Cout_p - Cout))
    b3p = jnp.pad(b3.astype(f32), (0, Cout_p - Cout))

    acc_shape = jax.ShapeDtypeStruct((8, Wd_p), f32)
    acc_spec = pl.BlockSpec((8, Wd_p), lambda i: (0, 0))
    vec_spec_w = pl.BlockSpec((1, Wd_p), lambda i: (0, 0))

    # ---- kernel 1: conv1 (1x1) + BN1 partial stats ---------------------------
    y1, s1, q1 = pl.pallas_call(
        _conv1_stats_kernel,
        out_shape=(jax.ShapeDtypeStruct((M, Wd_p), matmul_dtype),
                   acc_shape, acc_shape),
        grid=(n_tiles,),
        in_specs=[pl.BlockSpec((tile_m, Cin_p), lambda i: (i, 0)),
                  pl.BlockSpec((Cin_p, Wd_p), lambda i: (0, 0))],
        out_specs=(pl.BlockSpec((tile_m, Wd_p), lambda i: (i, 0)),
                   acc_spec, acc_spec),
        compiler_params=pltpu.CompilerParams(
            dimension_semantics=("arbitrary",), vmem_limit_bytes=VMEM_LIMIT),
        cost_estimate=pl.CostEstimate(
            flops=2 * M * Cin_p * Wd_p, transcendentals=0,
            bytes_accessed=(M * Cin_p + M * Wd_p) * itemsize),
    )(x2d, w1_p)
    sc1, sh1 = _bn_scale_shift(s1, q1, M, g1p, b1p)

    # ---- kernel 2: BN1+ReLU (deferred) + conv2 (3x3) + BN2 partial stats -----
    y2, s2, q2 = pl.pallas_call(
        _conv2_stats_kernel,
        out_shape=(jax.ShapeDtypeStruct((N, H, W, Wd_p), matmul_dtype),
                   acc_shape, acc_shape),
        grid=(N,),
        in_specs=[pl.BlockSpec((1, H, W, Wd_p), lambda n: (n, 0, 0, 0)),
                  vec_spec_w, vec_spec_w,
                  pl.BlockSpec((9 * Wd_p, Wd_p), lambda n: (0, 0))],
        out_specs=(pl.BlockSpec((1, H, W, Wd_p), lambda n: (n, 0, 0, 0)),
                   acc_spec, acc_spec),
        scratch_shapes=[pltpu.VMEM((H + 2, W + 2, Wd_p), matmul_dtype)],
        compiler_params=pltpu.CompilerParams(
            dimension_semantics=("arbitrary",), vmem_limit_bytes=VMEM_LIMIT),
        cost_estimate=pl.CostEstimate(
            flops=2 * M * 9 * Wd_p * Wd_p, transcendentals=0,
            bytes_accessed=2 * M * Wd_p * itemsize),
    )(y1.reshape(N, H, W, Wd_p), sc1, sh1, w2_flat)
    sc2, sh2 = _bn_scale_shift(s2, q2, M, g2p, b2p)

    # ---- kernel 3: BN2+ReLU (deferred) + conv3 (1x1) + BN3 partial stats -----
    acc3_shape = jax.ShapeDtypeStruct((8, Cout_p), f32)
    acc3_spec = pl.BlockSpec((8, Cout_p), lambda i: (0, 0))
    y3, s3, q3 = pl.pallas_call(
        _conv3_stats_kernel,
        out_shape=(jax.ShapeDtypeStruct((M, Cout_p), matmul_dtype),
                   acc3_shape, acc3_shape),
        grid=(n_tiles,),
        in_specs=[pl.BlockSpec((tile_m, Wd_p), lambda i: (i, 0)),
                  vec_spec_w, vec_spec_w,
                  pl.BlockSpec((Wd_p, Cout_p), lambda i: (0, 0))],
        out_specs=(pl.BlockSpec((tile_m, Cout_p), lambda i: (i, 0)),
                   acc3_spec, acc3_spec),
        compiler_params=pltpu.CompilerParams(
            dimension_semantics=("arbitrary",), vmem_limit_bytes=VMEM_LIMIT),
        cost_estimate=pl.CostEstimate(
            flops=2 * M * Wd_p * Cout_p, transcendentals=0,
            bytes_accessed=(M * Wd_p + M * Cout_p) * itemsize),
    )(y2.reshape(M, Wd_p), sc2, sh2, w3_p)
    sc3, sh3 = _bn_scale_shift(s3, q3, M, g3p, b3p)

    # ---- kernel 4: BN3 (deferred) + residual + ReLU (parallel grid) ----------
    out_p = pl.pallas_call(
        _bn_residual_relu_kernel,
        out_shape=jax.ShapeDtypeStruct((M, Cout_p), f32),
        grid=(n_tiles,),
        in_specs=[pl.BlockSpec((tile_m, Cout_p), lambda i: (i, 0)),
                  pl.BlockSpec((tile_m, Cin_p), lambda i: (i, 0)),
                  pl.BlockSpec((1, Cout_p), lambda i: (0, 0)),
                  pl.BlockSpec((1, Cout_p), lambda i: (0, 0))],
        out_specs=pl.BlockSpec((tile_m, Cout_p), lambda i: (i, 0)),
        compiler_params=pltpu.CompilerParams(
            dimension_semantics=("parallel",), vmem_limit_bytes=VMEM_LIMIT),
    )(y3, x2d, sc3, sh3)

    out = out_p[:, :Cout].reshape(N, H, W, Cout)
    return jnp.transpose(out, (0, 3, 1, 2))  # back to NCHW (PyTorch layout)


# ----------------------------------------------------------------------------
# Pure-JAX reference (same math as the PyTorch module in training-mode BN)
# ----------------------------------------------------------------------------
def bottleneck_ref(x_nchw, params):
    w1, g1, b1, w2, g2, b2, w3, g3, b3 = params

    def bn(y, g, b):
        mean = jnp.mean(y, axis=(0, 1, 2), keepdims=True)
        var = jnp.mean((y - mean) ** 2, axis=(0, 1, 2), keepdims=True)
        return (y - mean) * jax.lax.rsqrt(var + EPS) * g + b

    dn = ('NHWC', 'HWIO', 'NHWC')
    x = jnp.transpose(x_nchw, (0, 2, 3, 1)).astype(jnp.float32)
    y = jax.lax.conv_general_dilated(x, w1.reshape(1, 1, *w1.shape), (1, 1),
                                     'VALID', dimension_numbers=dn)
    y = jnp.maximum(bn(y, g1, b1), 0.0)
    y = jax.lax.conv_general_dilated(y, w2, (1, 1), ((1, 1), (1, 1)),
                                     dimension_numbers=dn)
    y = jnp.maximum(bn(y, g2, b2), 0.0)
    y = jax.lax.conv_general_dilated(y, w3.reshape(1, 1, *w3.shape), (1, 1),
                                     'VALID', dimension_numbers=dn)
    y = bn(y, g3, b3)
    y = jnp.maximum(y + x, 0.0)
    return jnp.transpose(y, (0, 3, 1, 2))


if __name__ == "__main__":
    # Module config: inplanes=16, planes=4 -> width=4, out_channels=planes*4=16
    inplanes, planes = 16, 4
    groups, base_width = 1, 64
    width = int(planes * (base_width / 64.0)) * groups
    cout = planes * 4
    N, H, W = 2, 16, 16

    key = jax.random.PRNGKey(0)
    k1, k2, k3, kx = jax.random.split(key, 4)
    # conv weights (bias=False); stored in matmul-friendly layouts
    w1 = jax.random.normal(k1, (inplanes, width), jnp.float32) * 0.1      # (Cin, width)
    w2 = jax.random.normal(k2, (3, 3, width, width), jnp.float32) * 0.1   # HWIO
    w3 = jax.random.normal(k3, (width, cout), jnp.float32) * 0.1          # (width, Cout)
    # BatchNorm2d default init: weight=1, bias=0
    g1, b1 = jnp.ones((width,), jnp.float32), jnp.zeros((width,), jnp.float32)
    g2, b2 = jnp.ones((width,), jnp.float32), jnp.zeros((width,), jnp.float32)
    g3, b3 = jnp.ones((cout,), jnp.float32), jnp.zeros((cout,), jnp.float32)
    params = (w1, g1, b1, w2, g2, b2, w3, g3, b3)

    x = jax.random.normal(kx, (N, inplanes, H, W), jnp.float32)  # NCHW

    ref = jax.block_until_ready(bottleneck_ref(x, params))

    # f32 MXU path (tight tolerance); tile_m=128 -> 4-step tiled grid
    out = jax.block_until_ready(
        bottleneck_forward(x, params, matmul_dtype=jnp.float32, tile_m=128))
    assert out.shape == (N, cout, H, W), out.shape
    assert np.allclose(np.asarray(out), np.asarray(ref), rtol=1e-3, atol=2e-3), \
        "f32 path mismatch vs pure-JAX reference"

    # bf16 MXU-input path (f32 accumulation / BN math) — looser tolerance
    out_bf16 = jax.block_until_ready(
        bottleneck_forward(x, params, matmul_dtype=jnp.bfloat16, tile_m=128))
    assert np.allclose(np.asarray(out_bf16), np.asarray(ref), rtol=1e-1, atol=1e-1), \
        "bf16 path mismatch vs pure-JAX reference"

    print("KERNEL_OK")
</pallas_src>

<mosaic_0001>
module attributes {stable_mosaic.version = 11 : i64} {
  func.func @_conv1_stats_kernel(%arg0: i32, %arg1: memref<128x128xf32, #tpu.memory_space<vmem>>, %arg2: memref<128x128xf32, #tpu.memory_space<vmem>>, %arg3: memref<128x128xf32, #tpu.memory_space<vmem>>, %arg4: memref<8x128xf32, #tpu.memory_space<vmem>>, %arg5: memref<8x128xf32, #tpu.memory_space<vmem>>) attributes {dimension_semantics = [#tpu.dimension_semantics<arbitrary>], iteration_bounds = array<i64: 4>, scalar_prefetch = 0 : i64, scratch_operands = 0 : i64, tpu.core_type = #tpu.core_type<tc>, window_params = [{transform_indices = @transform_0, window_bounds = array<i64: 128, 128>}, {pipeline_mode = #tpu.pipeline_mode<synchronous>, transform_indices = @transform_1, window_bounds = array<i64: 128, 128>}, {transform_indices = @transform_2, window_bounds = array<i64: 128, 128>}, {pipeline_mode = #tpu.pipeline_mode<synchronous>, transform_indices = @transform_3, window_bounds = array<i64: 8, 128>}, {pipeline_mode = #tpu.pipeline_mode<synchronous>, transform_indices = @transform_4, window_bounds = array<i64: 8, 128>}]} {
    %c0_i32 = arith.constant 0 : i32
    %0 = arith.cmpi eq, %arg0, %c0_i32 : i32
    %1 = arith.extui %0 : i1 to i32
    %c0_i32_0 = arith.constant 0 : i32
    %2 = arith.cmpi ne, %1, %c0_i32_0 : i32
    scf.if %2 {
      %cst_16 = arith.constant 0.000000e+00 : f32
      %17 = vector.broadcast %cst_16 : f32 to vector<8x128xf32>
      %c0_17 = arith.constant 0 : index
      %c0_18 = arith.constant 0 : index
      %18 = vector.load %arg4[%c0_17, %c0_18] : memref<8x128xf32, #tpu.memory_space<vmem>>, vector<8x128xf32>
      tpu.vector_store %arg4[%c0_17, %c0_18], %17 {strides = array<i32>} : memref<8x128xf32, #tpu.memory_space<vmem>>, vector<8x128xf32>,
      %cst_19 = arith.constant 0.000000e+00 : f32
      %19 = vector.broadcast %cst_19 : f32 to vector<8x128xf32>
      %c0_20 = arith.constant 0 : index
      %c0_21 = arith.constant 0 : index
      %20 = vector.load %arg5[%c0_20, %c0_21] : memref<8x128xf32, #tpu.memory_space<vmem>>, vector<8x128xf32>
      tpu.vector_store %arg5[%c0_20, %c0_21], %19 {strides = array<i32>} : memref<8x128xf32, #tpu.memory_space<vmem>>, vector<8x128xf32>,
    } else {
    }
    %c0 = arith.constant 0 : index
    %c0_1 = arith.constant 0 : index
    %3 = vector.load %arg1[%c0, %c0_1] : memref<128x128xf32, #tpu.memory_space<vmem>>, vector<128x128xf32>
    %c0_2 = arith.constant 0 : index
    %c0_3 = arith.constant 0 : index
    %4 = vector.load %arg2[%c0_2, %c0_3] : memref<128x128xf32, #tpu.memory_space<vmem>>, vector<128x128xf32>
    %cst = arith.constant dense<0.000000e+00> : vector<128x128xf32>
    %5 = tpu.matmul %3, %4, %cst {dimension_numbers = #tpu.dot_dimension_numbers<[1], [0], [0], [1], [0, 0, 1, 1], [], []>} : vector<128x128xf32>, vector<128x128xf32>, vector<128x128xf32> -> vector<128x128xf32>
    %c0_4 = arith.constant 0 : index
    %c0_5 = arith.constant 0 : index
    %6 = vector.load %arg3[%c0_4, %c0_5] : memref<128x128xf32, #tpu.memory_space<vmem>>, vector<128x128xf32>
    tpu.vector_store %arg3[%c0_4, %c0_5], %5 {strides = array<i32>} : memref<128x128xf32, #tpu.memory_space<vmem>>, vector<128x128xf32>,
    %7 = vector.shape_cast %5 : vector<128x128xf32> to vector<16x8x128xf32>
    %c0_6 = arith.constant 0 : index
    %c0_7 = arith.constant 0 : index
    %8 = vector.load %arg4[%c0_6, %c0_7] : memref<8x128xf32, #tpu.memory_space<vmem>>, vector<8x128xf32>
    %cst_8 = arith.constant dense<0.000000e+00> : vector<8x128xf32>
    %9 = vector.multi_reduction <add>, %7, %cst_8 [0] : vector<16x8x128xf32> to vector<8x128xf32>
    %10 = arith.addf %8, %9 : vector<8x128xf32>
    %c0_9 = arith.constant 0 : index
    %c0_10 = arith.constant 0 : index
    %11 = vector.load %arg4[%c0_9, %c0_10] : memref<8x128xf32, #tpu.memory_space<vmem>>, vector<8x128xf32>
    tpu.vector_store %arg4[%c0_9, %c0_10], %10 {strides = array<i32>} : memref<8x128xf32, #tpu.memory_space<vmem>>, vector<8x128xf32>,
    %c0_11 = arith.constant 0 : index
    %c0_12 = arith.constant 0 : index
    %12 = vector.load %arg5[%c0_11, %c0_12] : memref<8x128xf32, #tpu.memory_space<vmem>>, vector<8x128xf32>
    %13 = arith.mulf %7, %7 : vector<16x8x128xf32>
    %cst_13 = arith.constant dense<0.000000e+00> : vector<8x128xf32>
    %14 = vector.multi_reduction <add>, %13, %cst_13 [0] : vector<16x8x128xf32> to vector<8x128xf32>
    %15 = arith.addf %12, %14 : vector<8x128xf32>
    %c0_14 = arith.constant 0 : index
    %c0_15 = arith.constant 0 : index
    %16 = vector.load %arg5[%c0_14, %c0_15] : memref<8x128xf32, #tpu.memory_space<vmem>>, vector<8x128xf32>
    tpu.vector_store %arg5[%c0_14, %c0_15], %15 {strides = array<i32>} : memref<8x128xf32, #tpu.memory_space<vmem>>, vector<8x128xf32>,
    return
  }
  func.func @transform_0(%arg0: i32) -> (i32, i32) {
    %c0_i32 = arith.constant 0 : i32
    %c0_i32_0 = arith.constant 0 : i32
    return %arg0, %c0_i32 : i32, i32
  }
  func.func @transform_1(%arg0: i32) -> (i32, i32) {
    %c0_i32 = arith.constant 0 : i32
    %c0_i32_0 = arith.constant 0 : i32
    %c0_i32_1 = arith.constant 0 : i32
    return %c0_i32, %c0_i32_0 : i32, i32
  }
  func.func @transform_2(%arg0: i32) -> (i32, i32) {
    %c0_i32 = arith.constant 0 : i32
    %c0_i32_0 = arith.constant 0 : i32
    return %arg0, %c0_i32 : i32, i32
  }
  func.func @transform_3(%arg0: i32) -> (i32, i32) {
    %c0_i32 = arith.constant 0 : i32
    %c0_i32_0 = arith.constant 0 : i32
    %c0_i32_1 = arith.constant 0 : i32
    return %c0_i32, %c0_i32_0 : i32, i32
  }
  func.func @transform_4(%arg0: i32) -> (i32, i32) {
    %c0_i32 = arith.constant 0 : i32
    %c0_i32_0 = arith.constant 0 : i32
    %c0_i32_1 = arith.constant 0 : i32
    return %c0_i32, %c0_i32_0 : i32, i32
  }
}

</mosaic_0001>

<bundles_post_ra>
// kernel: tpu_custom_call.1
= control target key start
LH: loop header
LB: loop body
LE: loop exit
PB: predicated region body
PF: predicated region fallthrough
CT: control target
= control target key end

     0   :  { %10 = vsyncpa [#allocation3], 0  ;;  %s1325_s0 = inlined_call_operand.hbm [shape: f32[512,128], index: 0, kind: input, shape index: {}]   ;;  %s1326_s1 = inlined_call_operand.hbm [shape: f32[128,128], index: 1, kind: input, shape index: {}]   ;;  %s1327_s2 = inlined_call_operand.hbm [shape: f32[512,128], index: 2, kind: output, shape index: {0}]   ;;  %s1328_s3 = inlined_call_operand.hbm [shape: f32[8,128], index: 3, kind: output, shape index: {1}]   ;;  %s1329_s4 = inlined_call_operand.hbm [shape: f32[8,128], index: 4, kind: output, shape index: {2}]  }
   0x1   :  { %12 = vsyncpa [#allocation3 + $0x1], 0 }
   0x2   :  { %13 = vsyncpa [#allocation6], 0 }
   0x3   :  { %14 = vsyncpa [#allocation4], 0 }
   0x4   :  { %16 = vsyncpa [#allocation4 + $0x1], 0 }
   0x5   :  { %17 = vsyncpa [#allocation9], 0  ;;  %s1050_s15 = smov 0   ;;  %s1052_s16 = smov 0  }
   0x6   :  { %s1054_s17 = smov 0   ;;  %s1056_s18 = smov 0  }
   0x7 LB: > { %s1071_s19 = sadd.s32 4294967295, %s1013_s18   ;;  %s620_s20 = sadd.s32 4294967294, %s1013_s18   ;;  %s1013_s18 = sphi %s1056_s18, %s1357_s18   ;;  %s1009_s17 = sphi %s1054_s17, %s1356_s17   ;;  %s1005_s16 = sphi %s1052_s16, %s1355_s16   ;;  %s1001_s15 = sphi %s1050_s15, %s1354_s15  }
   0x8   : > { %p43_p0 = scmp.ne.s32.totalorder %s1005_s16, %s1001_s15  ;;  %p1330_p1 = scmp.eq.s32.totalorder %s1071_s19, 0 }
   0x9   : > { %p94_p3 = scmp.eq.s32.totalorder %s620_s20, 3  ;;  %p621_p5 = scmp.ge.s32.totalorder %s1013_s18, 1 }
   0xa   : > { %p1080_p4 = por %p1330_p1, %p43_p0  ;;  %p143_p7 = scmp.lt.s32.totalorder %s1013_s18, 5 }
   0xb   : > { %p1085_p6 = por %p94_p3, %p43_p0  ;;  %s1015_s24 = smov [#allocation5]  }
   0xc   : > { %s1334_s21 = scalar_select %p1080_p4, 1, 0 }
   0xd   : > { %s1335_s22 = scalar_select %p1085_p6, 1, 0 }
   0xe   : > { %p1091_p9 = pnand %p621_p5, %p143_p7  ;;  %s155_s25 = sshll.u32 %s1015_s24, 4  ;;  %s156_s25 = int_to_ptr.vmem [resolvable:$true] %s155_s25 }
   0xf   : > { %s1104_s27 = sadd.s32 1, %s1013_s18   ;;  %s30_s28 = sadd.s32 1, %s1009_s17 }
  0x10   : > { %s1336_s23 = scalar_select %p1091_p9, 1, 0 }
  0x11   : > { %p779_p10 = pneg %p1091_p9  ;;  %s27_s29 = ssub.s32 %s1013_s18, %s1104_s27 }
  0x12   : > { %s850_s30 = scalar_lea.vmem %s156_s25, 2048  ;;  %p858_p5 = scmp.lt.s32.totalorder %s156_s25, %s156_s25 }
  0x13   : > { %p1099_p11 = pnand %p779_p10, %p1330_p1  ;;  %p851_p13 = scmp.ne.s32.totalorder %s156_s25, %s850_s30 }
  0x14   : > { %p859_p7 = scmp.lt.s32.totalorder %s850_s30, %s850_s30 }
  0x15   : > { %p841_p12 = pneg %p1099_p11 }
  0x16   : > { %p860_p8 = por %p859_p7, %p858_p5 }
  0x17   : > { %p853_p0 = pnand %p851_p13, %p841_p12 }
  0x19   : > { %p854_p3 = pneg %p853_p0 }
  0x1b   : > { %p861_p2 = pnand %p860_p8, %p854_p3 }
  0x1d   : > { %864 = shalt.err (!%p861_p2)
}
  0x1e   : > { %s1016_s5 = smov 128   ;;  %s1017_s6 = smov 8  }
  0x1f   : > { %782 = dma.hbm_to_vmem [thread:$0]  (!%p1099_p11), %s1326_s1, 2048, %s156_s25, [#allocation6], %s1016_s5, %s1016_s5, %s1017_s6  }
  0x20   : > { %p28_p2 = scmp.eq.s32.totalorder %s27_s29, 0  ;;  %p37_p8 = scmp.ne.s32.totalorder %s1009_s17, %s1005_s16 }
  0x21   : > { %p38_p10 = scmp.eq.s32.totalorder %s1013_s18, 0  ;;  %p792_p12 = scmp.lt.s32.totalorder %s1013_s18, 4 }
  0x22   : > { %s1124_s9 = scalar_select %p28_p2, %s1009_s17, %s30_s28  }
  0x23   : > { %p39_p13 = por %p38_p10, %p37_p8  ;;  %p1338_p0 = scmp.eq.s32.totalorder %s1071_s19, 3 }
  0x24   : > { %s169_s11 = sand.u32 1, %s1009_s17   ;;  %s641_s12 = sshll.u32 %s1013_s18, 11 }
  0x25   : > { %p1128_p3 = por %p1338_p0, %p37_p8  ;;  %s624_s13 = sshll.u32 %s169_s11, 7 }
  0x26   : > { %s1137_s24 = scalar_lea.hbm %s1325_s0, %s641_s12  ;;  %s173_s25 = scalar_lea.vmem [#allocation2], %s624_s13 }
  0x27   : > { %s1339_s10 = scalar_select %p1128_p3, 1, 0 }
  0x28   : > { %s180_s26 = sshll.u32 %s173_s25, 4  ;;  %p1139_p11 = pnand %p792_p12, %p39_p13  ;;  %s1143_s26 = int_to_ptr.vmem [resolvable:$true] %s180_s26 }
  0x29   : > { %s1145_s29 = scalar_lea.sflag [#allocation3], %s169_s11  ;;  %s865_s30 = scalar_lea.hbm %s1137_s24, 2048 }
  0x2a   : > { %p866_p5 = scmp.ne.s32.totalorder %s1137_s24, %s865_s30  ;;  %p867_p7 = pneg %p1139_p11 }
  0x2b   : > { %s870_s12 = scalar_lea.hbm %s1325_s0, 8192  ;;  %p871_p10 = scmp.lt.s32.totalorder %s1137_s24, %s1325_s0 }
  0x2c   : > { %p868_p2 = pnand %p867_p7, %p866_p5  ;;  %p872_p12 = scmp.lt.s32.totalorder %s870_s12, %s865_s30 }
  0x2e   : > { %p869_p8 = pneg %p868_p2  ;;  %p873_p13 = por %p872_p12, %p871_p10 }
  0x30   : > { %p874_p0 = pnand %p873_p13, %p869_p8 }
  0x32   : > { %877 = shalt.err (!%p874_p0)
}
  0x33   : > { %s878_s11 = scalar_lea.vmem %s1143_s26, 2048  ;;  %s1018_s20 = smov [#allocation2]  }
  0x34   : > { %p879_p1 = scmp.ne.s32.totalorder %s1143_s26, %s878_s11  ;;  %s883_s25 = sshll.u32 %s1018_s20, 4  ;;  %s884_s25 = int_to_ptr.vmem [resolvable:$false] %s883_s25 }
  0x35   : > { %s885_s7 = scalar_lea.vmem %s884_s25, 4096  ;;  %p886_p2 = scmp.lt.s32.totalorder %s1143_s26, %s884_s25 }
  0x36   : > { %p881_p6 = pnand %p879_p1, %p867_p7  ;;  %p887_p3 = scmp.lt.s32.totalorder %s885_s7, %s878_s11 }
  0x38   : > { %p882_p5 = pneg %p881_p6  ;;  %p888_p4 = por %p887_p3, %p886_p2 }
  0x3a   : > { %p889_p9 = pnand %p888_p4, %p882_p5 }
  0x3c   : > { %892 = shalt.err (!%p889_p9)
}
  0x3d   : > { %786 = dma.hbm_to_vmem [thread:$0]  (!%p1139_p11), %s1137_s24, 2048, %s1143_s26, %s1145_s29, %s1016_s5, %s1016_s5, %s1017_s6  }
  0x3e   : > { %p1341_p1 = scmp.ne.s32.totalorder %s1336_s23, 0 }
  0x3f   : > { %s1172_s30 = sand.u32 (!%p1341_p1), 1, %s1005_s16   ;;  %p1342_p4 = scmp.ne.s32.totalorder (!%p1341_p1), %s1334_s21, 0 }
  0x40   : > { %192 = sbr.rel (%p1341_p1) target bundleno = 374 (0x176), region = 28  ;;  %s628_s8 = sshll.u32 (!%p1341_p1), %s1172_s30, 7 }
  0x41   : > { %s195_s12 = scalar_lea.sflag (!%p1341_p1), [#allocation3], %s1172_s30  ;;  %s1176_s13 = scalar_lea.vmem (!%p1341_p1), [#allocation2], %s628_s8 }
  0x45   : > { %984 = dma.done.wait (%p1342_p4), %s195_s12, 2048  }
  0x46   : > { %986 = vsyncadd (%p1342_p4), %s195_s12, 4294965248  ;;  %p1343_p6 = scmp.eq.s32.totalorder %s1071_s19, 0 }
  0x48   : > { %988 = dma.done.wait (%p1343_p6), [#allocation6], 2048   ;;  %p1344_p9 = pmov %p1343_p6 }
  0x49   : > { %s1186_s23 = scalar_lea.vmem [#allocation7], %s628_s8  ;;  %p1345_p3 = scmp.ne.s32.totalorder %s1071_s19, 0 }
  0x4a   : > { %990 = vsyncadd (%p1344_p9), [#allocation6], 4294965248 }
  0x4b   : > { %232 = sbr.rel (%p1345_p3) target bundleno = 82 (0x52), region = 40 }
  0x50   : > { %v1019_v0 = vmov 0.0  }
  0x51   : > { %233 = vst [vmem:[#allocation8] sm:$0xff] %v1019_v0  ;;  %234 = vst [vmem:[#allocation10] sm:$0xff] %v1019_v0 }
  0x52 PF: > { %v266_v1 = vld [vmem:[#allocation5 + $0x78] sm:$0xff]  ;;  %v265_v2 = vld [vmem:[#allocation5 + $0x70] sm:$0xff]  ;;  %v264_v3 = vld [vmem:[#allocation5 + $0x68] sm:$0xff]  ;;  %s642_s21 = sshll.u32 %s1071_s19, 11  ;;  %s494_s5 = sshll.u32 %s1186_s23, 4  ;;  %s1243_s5 = int_to_ptr.vmem [resolvable:$true] %s494_s5 }
  0x53   : > { %675 = vmatprep.subr.mxu0 %v266_v1  ;;  %731 = vmatprep.subr.mxu1 %v266_v1  ;;  %v263_v4 = vld [vmem:[#allocation5 + $0x60] sm:$0xff]  ;;  %v262_v5 = vld [vmem:[#allocation5 + $0x58] sm:$0xff]  ;;  %v261_v6 = vld [vmem:[#allocation5 + $0x50] sm:$0xff]  ;;  %s1241_s26 = scalar_lea.hbm %s1327_s2, %s642_s21  ;;  %s481_s28 = scalar_lea.sflag [#allocation4], %s1172_s30 }
  0x54   : > { %676 = vmatpush3.msra.mxu0 %v266_v1  ;;  %747 = vmatpush3.msra.mxu1 %v266_v1  ;;  %v260_v7 = vld [vmem:[#allocation5 + $0x48] sm:$0xff]  ;;  %v259_v8 = vld [vmem:[#allocation5 + $0x40] sm:$0xff]  ;;  %v258_v9 = vld [vmem:[#allocation5 + $0x38] sm:$0xff]  ;;  %s893_s29 = scalar_lea.vmem %s1243_s5, 2048  ;;  %p1346_p7 = scmp.ne.s32.totalorder %s1339_s10, 0 }
  0x55   : > { %677 = vmatprep.subr.mxu0 %v265_v2  ;;  %732 = vmatprep.subr.mxu1 %v265_v2  ;;  %v257_v10 = vld [vmem:[#allocation5 + $0x30] sm:$0xff]  ;;  %v235_v11 = vld [vmem:[%s1176_s13] sm:$0xff]  ;;  %v256_v12 = vld [vmem:[#allocation5 + $0x28] sm:$0xff]  ;;  %p894_p11 = scmp.ne.s32.totalorder %s1243_s5, %s893_s29  ;;  %s1020_s14 = smov [#allocation7]  }
  0x56   : > { %678 = vmatpush3.msra.mxu0 %v265_v2  ;;  %748 = vmatpush3.msra.mxu1 %v265_v2  ;;  %v255_v13 = vld [vmem:[#allocation5 + $0x20] sm:$0xff]  ;;  %v254_v14 = vld [vmem:[#allocation5 + $0x18] sm:$0xff]  ;;  %v253_v15 = vld [vmem:[#allocation5 + $0x10] sm:$0xff]  ;;  %s897_s11 = sshll.u32 %s1020_s14, 4  ;;  %s898_s11 = int_to_ptr.vmem [resolvable:$false] %s897_s11 }
  0x57   : > { %679 = vmatprep.subr.mxu0 %v264_v3  ;;  %733 = vmatprep.subr.mxu1 %v264_v3  ;;  %v252_v16 = vld [vmem:[#allocation5 + $0x8] sm:$0xff]  ;;  %v251_v17 = vld [vmem:[#allocation5] sm:$0xff]  ;;  %v237_v19 = vld [vmem:[%s1176_s13 + $0x10] sm:$0xff]  ;;  %p895_p8 = pnand %p894_p11, %p1346_p7  ;;  %s899_s20 = scalar_lea.vmem %s898_s11, 4096 }
  0x58   : > { %680 = vmatpush3.msra.mxu0 %v264_v3  ;;  %749 = vmatpush3.msra.mxu1 %v264_v3  ;;  %v236_v18 = vld [vmem:[%s1176_s13 + $0x8] sm:$0xff]  ;;  %v243_v20 = vld [vmem:[%s1176_s13 + $0x40] sm:$0xff]  ;;  %v245_v22 = vld [vmem:[%s1176_s13 + $0x50] sm:$0xff]  ;;  %p900_p12 = scmp.lt.s32.totalorder %s1243_s5, %s898_s11  ;;  %p901_p13 = scmp.lt.s32.totalorder %s899_s20, %s893_s29 }
  0x59   : > { %681 = vmatprep.subr.mxu0 %v263_v4  ;;  %734 = vmatprep.subr.mxu1 %v263_v4  ;;  %v244_v21 = vld [vmem:[%s1176_s13 + $0x48] sm:$0xff]  ;;  %v238_v23 = vld [vmem:[%s1176_s13 + $0x18] sm:$0xff]  ;;  %v239_v24 = vld [vmem:[%s1176_s13 + $0x20] sm:$0xff]  ;;  %p896_p10 = pneg %p895_p8 }
  0x5a   : > { %682 = vmatpush3.msra.mxu0 %v263_v4  ;;  %750 = vmatpush3.msra.mxu1 %v263_v4  ;;  %v246_v25 = vld [vmem:[%s1176_s13 + $0x58] sm:$0xff]  ;;  %v247_v26 = vld [vmem:[%s1176_s13 + $0x60] sm:$0xff]  ;;  %v240_v27 = vld [vmem:[%s1176_s13 + $0x28] sm:$0xff]  ;;  %p902_p0 = por %p901_p13, %p900_p12 }
  0x5b   : > { %683 = vmatprep.subr.mxu0 %v262_v5  ;;  %735 = vmatprep.subr.mxu1 %v262_v5  ;;  %v241_v28 = vld [vmem:[%s1176_s13 + $0x30] sm:$0xff]  ;;  %v248_v29 = vld [vmem:[%s1176_s13 + $0x68] sm:$0xff]  ;;  %v242_v31 = vld [vmem:[%s1176_s13 + $0x38] sm:$0xff] }
  0x5c   : > { %684 = vmatpush3.msra.mxu0 %v262_v5  ;;  %751 = vmatpush3.msra.mxu1 %v262_v5  ;;  %v249_v30 = vld [vmem:[%s1176_s13 + $0x70] sm:$0xff]  ;;  %v250_v32 = vld [vmem:[%s1176_s13 + $0x78] sm:$0xff]  ;;  %p903_p5 = pnand %p902_p0, %p896_p10 }
  0x5d   : > { %685 = vmatprep.subr.mxu0 %v261_v6  ;;  %736 = vmatprep.subr.mxu1 %v261_v6 }
  0x5e   : > { %686 = vmatpush3.msra.mxu0 %v261_v6  ;;  %752 = vmatpush3.msra.mxu1 %v261_v6 }
  0x5f   : > { %687 = vmatprep.subr.mxu0 %v260_v7  ;;  %737 = vmatprep.subr.mxu1 %v260_v7 }
  0x60   : > { %688 = vmatpush3.msra.mxu0 %v260_v7  ;;  %753 = vmatpush3.msra.mxu1 %v260_v7 }
  0x61   : > { %689 = vmatprep.subr.mxu0 %v259_v8  ;;  %738 = vmatprep.subr.mxu1 %v259_v8 }
  0x62   : > { %690 = vmatpush3.msra.mxu0 %v259_v8  ;;  %754 = vmatpush3.msra.mxu1 %v259_v8 }
  0x63   : > { %691 = vmatprep.subr.mxu0 %v258_v9  ;;  %739 = vmatprep.subr.mxu1 %v258_v9 }
  0x64   : > { %692 = vmatpush3.msra.mxu0 %v258_v9  ;;  %755 = vmatpush3.msra.mxu1 %v258_v9 }
  0x65   : > { %693 = vmatprep.subr.mxu0 %v257_v10  ;;  %707 = vmatprep.mubr.f32.mxu0 %v235_v11 }
  0x66   : > { %694 = vmatpush3.msra.mxu0 %v257_v10  ;;  %740 = vmatprep.subr.mxu1 %v257_v10 }
  0x67   : > { %695 = vmatprep.subr.mxu0 %v256_v12  ;;  %756 = vmatpush3.msra.mxu1 %v257_v10 }
  0x68   : > { %696 = vmatpush3.msra.mxu0 %v256_v12  ;;  %741 = vmatprep.subr.mxu1 %v256_v12 }
  0x69   : > { %697 = vmatprep.subr.mxu0 %v255_v13  ;;  %757 = vmatpush3.msra.mxu1 %v256_v12 }
  0x6a   : > { %698 = vmatpush3.msra.mxu0 %v255_v13  ;;  %742 = vmatprep.subr.mxu1 %v255_v13 }
  0x6b   : > { %699 = vmatprep.subr.mxu0 %v254_v14  ;;  %758 = vmatpush3.msra.mxu1 %v255_v13 }
  0x6c   : > { %700 = vmatpush3.msra.mxu0 %v254_v14  ;;  %743 = vmatprep.subr.mxu1 %v254_v14 }
  0x6d   : > { %701 = vmatprep.subr.mxu0 %v253_v15  ;;  %759 = vmatpush3.msra.mxu1 %v254_v14 }
  0x6e   : > { %702 = vmatpush3.msra.mxu0 %v253_v15  ;;  %744 = vmatprep.subr.mxu1 %v253_v15 }
  0x6f   : > { %703 = vmatprep.subr.mxu0 %v252_v16  ;;  %760 = vmatpush3.msra.mxu1 %v253_v15 }
  0x70   : > { %704 = vmatpush3.msra.mxu0 %v252_v16  ;;  %745 = vmatprep.subr.mxu1 %v252_v16 }
  0x71   : > { %705 = vmatprep.subr.mxu0 %v251_v17  ;;  %761 = vmatpush3.msra.mxu1 %v252_v16 }
  0x72   : > { %706 = vmatpush3.msra.mxu0 %v251_v17  ;;  %746 = vmatprep.subr.mxu1 %v251_v17 }
  0x73   : > { %708 = vmatmul.mubr.f32.vlgmr.msra.gmra.mxu0 %v236_v18  ;;  %762 = vmatpush3.msra.mxu1 %v251_v17 }
  0x74   : > { %710 = vmatprep.mubr.f32.mxu0 %v237_v19  ;;  %719 = vmatprep.mubr.f32.mxu1 %v243_v20 }
  0x75   : > { %720 = vmatmul.mubr.f32.vlgmr.msra.gmra.mxu1 %v244_v21 }
  0x76   : > { %722 = vmatprep.mubr.f32.mxu1 %v245_v22 }
  0x77   : > { %711 = vmatmul.mubr.f32.gmra.mxu0 %v238_v23 }
  0x78   : > { %713 = vmatprep.mubr.f32.mxu0 %v239_v24 }
  0x79   : > { %723 = vmatmul.mubr.f32.gmra.mxu1 %v246_v25 }
  0x7a   : > { %725 = vmatprep.mubr.f32.mxu1 %v247_v26 }
  0x7b   : > { %714 = vmatmul.mubr.f32.gmra.mxu0 %v240_v27 }
  0x7c   : > { %716 = vmatprep.mubr.f32.mxu0 %v241_v28 }
  0x7d   : > { %726 = vmatmul.mubr.f32.gmra.mxu1 %v248_v29 }
  0x7e   : > { %728 = vmatprep.mubr.f32.mxu1 %v249_v30 }
  0x7f   : > { %717 = vmatmul.mubr.f32.gmra.mxu0 %v242_v31 }
  0x81   : > { %729 = vmatmul.mubr.f32.gmra.mxu1 %v250_v32 }
 0x133   : > { %v709_v33 = vpop.f32.mrf.mxu0 }
 0x134   : > { %413 = vst [vmem:[%s1186_s23 + $0x8] sm:$0xff] %v709_v33  ;;  %v448_v39 = vmul.f32 %v709_v33, %v709_v33 }
 0x135   : > { %v333_v34 = vpop.f32.mrf.mxu0  ;;  %v1207_v35 = vpop.f32.mrf.mxu1 }
 0x136   : > { %412 = vst [vmem:[%s1186_s23] sm:$0xff] %v333_v34  ;;  %v447_v36 = vmul.f32 %v333_v34, %v333_v34  ;;  %421 = vst [vmem:[%s1186_s23 + $0x48] sm:$0xff] %v1207_v35  ;;  %v429_v40 = vadd.f32 %v709_v33, %v333_v34 }
 0x137   : > { %v712_v37 = vpop.f32.mrf.mxu0  ;;  %v1212_v38 = vpop.f32.mrf.mxu1 }
 0x138   : > { %415 = vst [vmem:[%s1186_s23 + $0x18] sm:$0xff] %v712_v37  ;;  %420 = vst [vmem:[%s1186_s23 + $0x40] sm:$0xff] %v1212_v38  ;;  %v463_v43 = vadd.f32 %v448_v39, %v447_v36  ;;  %v450_v48 = vmul.f32 %v712_v37, %v712_v37 }
 0x139   : > { %v343_v41 = vpop.f32.mrf.mxu0  ;;  %v1217_v42 = vpop.f32.mrf.mxu1 }
 0x13a   : > { %414 = vst [vmem:[%s1186_s23 + $0x10] sm:$0xff] %v343_v41  ;;  %v430_v44 = vadd.f32 %v429_v40, %v343_v41  ;;  %v449_v45 = vmul.f32 %v343_v41, %v343_v41  ;;  %423 = vst [vmem:[%s1186_s23 + $0x58] sm:$0xff] %v1217_v42 }
 0x13b   : > { %v715_v46 = vpop.f32.mrf.mxu0  ;;  %v1222_v47 = vpop.f32.mrf.mxu1 }
 0x13c   : > { %v464_v49 = vadd.f32 %v463_v43, %v449_v45  ;;  %417 = vst [vmem:[%s1186_s23 + $0x28] sm:$0xff] %v715_v46  ;;  %v431_v50 = vadd.f32 %v712_v37, %v430_v44  ;;  %422 = vst [vmem:[%s1186_s23 + $0x50] sm:$0xff] %v1222_v47  ;;  %v452_v58 = vmul.f32 %v715_v46, %v715_v46 }
 0x13d   : > { %v353_v51 = vpop.f32.mrf.mxu0  ;;  %v1227_v52 = vpop.f32.mrf.mxu1 }
 0x13e   : > { %416 = vst [vmem:[%s1186_s23 + $0x20] sm:$0xff] %v353_v51  ;;  %v432_v53 = vadd.f32 %v431_v50, %v353_v51  ;;  %v451_v54 = vmul.f32 %v353_v51, %v353_v51  ;;  %v465_v55 = vadd.f32 %v464_v49, %v450_v48  ;;  %425 = vst [vmem:[%s1186_s23 + $0x68] sm:$0xff] %v1227_v52 }
 0x13f   : > { %v718_v56 = vpop.f32.mrf.mxu0  ;;  %v393_v57 = vpop.f32.mrf.mxu1 }
 0x140   : > { %v466_v59 = vadd.f32 %v465_v55, %v451_v54  ;;  %419 = vst [vmem:[%s1186_s23 + $0x38] sm:$0xff] %v718_v56  ;;  %v433_v60 = vadd.f32 %v715_v46, %v432_v53  ;;  %424 = vst [vmem:[%s1186_s23 + $0x60] sm:$0xff] %v393_v57  ;;  %v454_v3 = vmul.f32 %v718_v56, %v718_v56 }
 0x141   : > { %v363_v61 = vpop.f32.mrf.mxu0  ;;  %v1236_v62 = vpop.f32.mrf.mxu1 }
 0x142   : > { %418 = vst [vmem:[%s1186_s23 + $0x30] sm:$0xff] %v363_v61  ;;  %v434_v63 = vadd.f32 %v433_v60, %v363_v61  ;;  %v453_v0 = vmul.f32 %v363_v61, %v363_v61  ;;  %v467_v1 = vadd.f32 %v466_v59, %v452_v58  ;;  %427 = vst [vmem:[%s1186_s23 + $0x78] sm:$0xff] %v1236_v62 }
 0x143   : > { %v403_v2 = vpop.f32.mrf.mxu1 }
 0x144   : > { %v435_v4 = vadd.f32 %v718_v56, %v434_v63  ;;  %v468_v5 = vadd.f32 %v467_v1, %v453_v0  ;;  %426 = vst [vmem:[%s1186_s23 + $0x70] sm:$0xff] %v403_v2 }
 0x145   : > { %906 = shalt.err (!%p903_p5)
}
 0x146   : > { %s907_s25 = scalar_lea.hbm %s1241_s26, 2048  ;;  %s911_s12 = scalar_lea.hbm %s1327_s2, 8192 }
 0x147   : > { %p908_p2 = scmp.ne.s32.totalorder %s1241_s26, %s907_s25  ;;  %p912_p6 = scmp.lt.s32.totalorder %s1241_s26, %s1327_s2 }
 0x148   : > { %p913_p9 = scmp.lt.s32.totalorder %s911_s12, %s907_s25 }
 0x149   : > { %p909_p1 = pnand %p908_p2, %p1346_p7 }
 0x14a   : > { %p914_p3 = por %p913_p9, %p912_p6 }
 0x14b   : > { %p910_p4 = pneg %p909_p1 }
 0x14d   : > { %p915_p11 = pnand %p914_p3, %p910_p4 }
 0x14f   : > { %918 = shalt.err (!%p915_p11)
}
 0x150   : > { %s1021_s21 = smov 128   ;;  %s1022_s6 = smov 8   ;;  %v469_v6 = vadd.f32 %v468_v5, %v454_v3  ;;  %v436_v7 = vadd.f32 %v435_v4, %v1212_v38  ;;  %v455_v8 = vmul.f32 %v1212_v38, %v1212_v38  ;;  %v456_v9 = vmul.f32 %v1207_v35, %v1207_v35  ;;  %v428_v27 = vld [vmem:[#allocation8] sm:$0xff]  ;;  %v446_v31 = vld [vmem:[#allocation10] sm:$0xff] }
 0x151   : > { %769 = dma.vmem_to_hbm [thread:$0]  (%p1346_p7), %s1243_s5, 2048, %s1241_s26, %s481_s28, %s1021_s21, %s1021_s21, %s1022_s6   ;;  %v457_v13 = vmul.f32 %v1222_v47, %v1222_v47  ;;  %v458_v15 = vmul.f32 %v1217_v42, %v1217_v42  ;;  %v459_v19 = vmul.f32 %v393_v57, %v393_v57  ;;  %v460_v21 = vmul.f32 %v1227_v52, %v1227_v52 }
 0x152   : > { %v470_v10 = vadd.f32 %v469_v6, %v455_v8  ;;  %v437_v11 = vadd.f32 %v1207_v35, %v436_v7  ;;  %v461_v25 = vmul.f32 %v403_v2, %v403_v2  ;;  %s1023_s10 = smov [#allocation8]   ;;  %v462_v28 = vmul.f32 %v1236_v62, %v1236_v62  ;;  %s1024_s5 = smov [#allocation10]  }
 0x153   : > { %s508_s30 = sshll.u32 %s1023_s10, 4  ;;  %s519_s24 = sshll.u32 %s1024_s5, 4  ;;  %s509_s30 = int_to_ptr.vmem [resolvable:$true] %s508_s30  ;;  %s520_s24 = int_to_ptr.vmem [resolvable:$true] %s519_s24 }
 0x154   : > { %v438_v12 = vadd.f32 %v437_v11, %v1222_v47  ;;  %v471_v14 = vadd.f32 %v470_v10, %v456_v9  ;;  %s919_s26 = scalar_lea.vmem %s509_s30, 128  ;;  %p1347_p8 = scmp.eq.s32.totalorder %s1071_s19, 3 }
 0x155   : > { %p920_p7 = scmp.ne.s32.totalorder %s509_s30, %s919_s26  ;;  %p926_p13 = scmp.lt.s32.totalorder %s509_s30, %s509_s30 }
 0x156   : > { %v472_v16 = vadd.f32 %v471_v14, %v457_v13  ;;  %v439_v17 = vadd.f32 %v1217_v42, %v438_v12  ;;  %p927_p0 = scmp.lt.s32.totalorder %s919_s26, %s919_s26 }
 0x157   : > { %p921_p10 = pnand %p920_p7, %p1347_p8 }
 0x158   : > { %v440_v18 = vadd.f32 %v439_v17, %v393_v57  ;;  %v473_v20 = vadd.f32 %v472_v16, %v458_v15  ;;  %p928_p5 = por %p927_p0, %p926_p13 }
 0x159   : > { %p922_p12 = pneg %p921_p10 }
 0x15a   : > { %v474_v22 = vadd.f32 %v473_v20, %v459_v19  ;;  %v441_v23 = vadd.f32 %v1227_v52, %v440_v18 }
 0x15b   : > { %p929_p2 = pnand %p928_p5, %p922_p12 }
 0x15c   : > { %v442_v24 = vadd.f32 %v441_v23, %v403_v2  ;;  %v475_v26 = vadd.f32 %v474_v22, %v460_v21 }
 0x15e   : > { %v443_v29 = vadd.f32 %v1236_v62, %v442_v24  ;;  %v476_v30 = vadd.f32 %v475_v26, %v461_v25 }
 0x160   : > { %v444_v32 = vadd.f32 %v443_v29, %v428_v27  ;;  %v477_v33 = vadd.f32 %v476_v30, %v462_v28 }
 0x162   : > { %445 = vst [vmem:[#allocation8] sm:$0xff] %v444_v32  ;;  %v478_v34 = vadd.f32 %v477_v33, %v446_v31 }
 0x163   : > { %932 = shalt.err (!%p929_p2)
}
 0x164   : > { %p1348_p1 = pmov %p1347_p8  ;;  %479 = vst [vmem:[#allocation10] sm:$0xff] %v478_v34  ;;  %s943_s14 = scalar_lea.vmem %s520_s24, 128 }
 0x165   : > { %p944_p4 = scmp.ne.s32.totalorder %s520_s24, %s943_s14  ;;  %p950_p11 = scmp.lt.s32.totalorder %s520_s24, %s520_s24 }
 0x166   : > { %771 = dma.vmem_to_hbm [thread:$0]  (%p1348_p1), %s509_s30, 128, %s1328_s3, [#allocation9]  }
 0x167   : > { %p1349_p6 = pmov %p1348_p1  ;;  %p951_p7 = scmp.lt.s32.totalorder %s943_s14, %s943_s14 }
 0x169   : > { %p945_p9 = pnand %p944_p4, %p1349_p6  ;;  %p952_p8 = por %p951_p7, %p950_p11 }
 0x16b   : > { %p946_p3 = pneg %p945_p9 }
 0x16d   : > { %p953_p10 = pnand %p952_p8, %p946_p3 }
 0x16f   : > { %956 = shalt.err (!%p953_p10)
}
 0x170   : > { %p1350_p12 = pmov %p1348_p1  ;;  %p1351_p13 = pmov %p1348_p1 }
 0x172   : > { %773 = dma.vmem_to_hbm [thread:$0]  (%p1350_p12), %s520_s24, 128, %s1329_s4, [#allocation9]  }
 0x173   : > { %992 = dma.done.wait (%p1351_p13), [#allocation9], 256   ;;  %p1352_p0 = pmov %p1348_p1 }
 0x175   : > { %994 = vsyncadd (%p1352_p0), [#allocation9], 4294967040 }
 0x176 PF: > { %p798_p5 = scmp.ge.s32.totalorder %s1013_s18, 2  ;;  %s539_s25 = sand.u32 1, %s1001_s15  }
 0x177   : > { %p1353_p2 = scmp.ne.s32.totalorder %s1335_s22, 0  ;;  %s540_s7 = scalar_lea.sflag [#allocation4], %s539_s25 }
 0x179   : > { %p788_p1 = pnand %p798_p5, %p1353_p2 }
 0x17b   : > { %p789_p4 = pneg %p788_p1 }
 0x17d   : > { %996 = dma.done.wait (%p789_p4), %s540_s7, 2048  }
 0x17e   : > { %998 = vsyncadd (%p789_p4), %s540_s7, 4294965248  ;;  %p20_p6 = scmp.ge.s32.totalorder %s1104_s27, 6   ;;  %s1354_s15 = smov %s1005_s16 }
 0x17f   : > { %s1355_s16 = smov %s1009_s17  ;;  %s1356_s17 = smov %s1124_s9 }
 0x180   : > { %s1357_s18 = smov %s1104_s27  ;;  %22 = sbr.rel (!%p20_p6) target bundleno = 7 (0x7), region = 97 }
 0x185   :  { %545 = vsyncpa [#allocation3], 1 }
 0x186   :  { %547 = vsyncpa [#allocation3 + $0x1], 1 }
 0x187   :  { %548 = vsyncpa [#allocation6], 1 }
 0x188   :  { %549 = vsyncpa [#allocation4], 1 }
 0x189   :  { %551 = vsyncpa [#allocation4 + $0x1], 1 }
 0x18a   :  { %552 = vsyncpa [#allocation9], 1 }

</bundles_post_ra>
